<compile_context>
chip_gen: v7x
topology: tpu7x:2x2x1
jax: 0.10.0
libtpu: 0.0.40
codegen_flags: <defaults>
</compile_context>

<pallas_src>
import functools

import jax
import jax.numpy as jnp
from jax.experimental import pallas as pl
from jax.experimental.pallas import tpu as pltpu


def _bce_partial_kernel(x_ref, y_ref, out_ref, acc_ref, *, tail_len):
    """Grid = (row-tiles, spatial-outer, spatial-inner); inner axis accumulates."""
    so = pl.program_id(1)
    si = pl.program_id(2)
    n_so = pl.num_programs(1)
    n_si = pl.num_programs(2)

    x = x_ref[...].astype(jnp.float32)
    y = y_ref[...].astype(jnp.float32)
    # BCEWithLogitsLoss (no weights): max(x, 0) - x*y + log(1 + exp(-|x|))
    loss = jnp.maximum(x, 0.0) - x * y + jnp.log1p(jnp.exp(-jnp.abs(x)))

    def _accumulate(val):
        # First spatial-inner step overwrites the accumulator (no separate
        # zero-init pass); later steps add.  Pure VPU work, hides under DMA.
        @pl.when(si == 0)
        def _():
            acc_ref[...] = val

        @pl.when(si > 0)
        def _():
            acc_ref[...] += val

    if tail_len is None:
        _accumulate(loss)
    else:
        # Ragged last spatial tile: the OOB lanes of the final input block hold
        # undefined data, so mask them — but only on that final global step, so
        # the iota/compare/select stays off the hot loop.
        is_tail = jnp.logical_and(so == n_so - 1, si == n_si - 1)

        @pl.when(jnp.logical_not(is_tail))
        def _():
            _accumulate(loss)

        @pl.when(is_tail)
        def _():
            lane = jax.lax.broadcasted_iota(jnp.int32, loss.shape, dimension=1)
            _accumulate(jnp.where(lane < tail_len, loss, 0.0))

    @pl.when(si == n_si - 1)
    def _():
        # One cross-lane reduce per (row-tile, spatial-outer) chunk.
        out_ref[...] = jnp.reshape(jnp.sum(acc_ref[...]), (1, 1, 1, 1))


def _pick_tr(R, sublane_multiple):
    """Row tile: sublane-packed if possible, but keep >=2 row tiles when we can."""
    candidates = list(dict.fromkeys([sublane_multiple, 8]))
    for c in candidates:                       # prefer keeping the parallel axis >= 2
        if R % c == 0 and R // c >= 2:
            return c
    for c in candidates:
        if R % c == 0:
            return c
    return R                                   # full dim is always legal


def _choose_tiles(R, S, min_itemsize, max_itemsize, target_tile_bytes):
    # Sub-32-bit dtypes pack along sublanes: bf16 wants tr % 16 == 0 (f32: 8).
    sublane_multiple = 8 * max(1, 4 // max(1, min_itemsize))
    tr = _pick_tr(R, sublane_multiple)

    # Lane tile: multiple of 128 (or full S), sized toward target_tile_bytes/input.
    max_lanes = max(128, target_tile_bytes // (tr * max_itemsize))
    if S <= max_lanes:
        ts = S
    else:
        ts = (max_lanes // 128) * 128
        # Prefer a ts that divides S (no ragged tail => no masking at all), as
        # long as it keeps the tile at >= half the budget.
        for cand in range(ts, max(127, ts // 2 - 1), -128):
            if S % cand == 0:
                ts = cand
                break

    # If one lane tile covers S, widen the row tile toward the budget, but never
    # collapse the parallel row axis below two tiles (keeps both v7x TCs fed).
    if ts == S:
        while (tr * 2 <= R and R % (tr * 2) == 0
               and R // (tr * 2) >= 2
               and tr * 2 * ts * max_itemsize <= target_tile_bytes):
            tr *= 2
    return tr, ts


def bce_with_logits_mean_2d(pred2, lab2, *, target_tile_bytes=4 * 1024 * 1024):
    """pred2, lab2: (R, S) float arrays (f32 or bf16). Returns scalar mean BCE-with-logits."""
    R, S = pred2.shape
    assert lab2.shape == (R, S), (pred2.shape, lab2.shape)
    pred_item = jnp.dtype(pred2.dtype).itemsize
    lab_item = jnp.dtype(lab2.dtype).itemsize
    tr, ts = _choose_tiles(R, S, min(pred_item, lab_item), max(pred_item, lab_item),
                           target_tile_bytes)

    n_r = R // tr
    n_s = pl.cdiv(S, ts)
    tail = S - (n_s - 1) * ts
    tail_len = None if tail == ts else tail     # static; mask only if ragged

    # If the row axis cannot feed both v7x TensorCores, split the spatial tiles
    # into two parallel chunks (inner chunk stays the sequential accumulator axis).
    if n_r == 1 and n_s >= 2 and n_s % 2 == 0:
        n_so, n_si = 2, n_s // 2
    else:
        n_so, n_si = 1, n_s

    kernel = functools.partial(_bce_partial_kernel, tail_len=tail_len)

    # VMEM footprint: 2 double-buffered input tiles + f32 accumulator, plus margin
    # for compiler-internal scratch / tiny output blocks.  Stays well inside the
    # 64 MiB physical VMEM of v7x even with 4 MiB tiles.
    tile_elems = tr * ts
    footprint = 2 * tile_elems * (pred_item + lab_item) + tile_elems * 4
    vmem_limit = min(footprint + (12 << 20), 64 << 20)

    partials = pl.pallas_call(
        kernel,
        out_shape=jax.ShapeDtypeStruct((n_r, n_so, 1, 1), jnp.float32),
        grid_spec=pltpu.PrefetchScalarGridSpec(
            num_scalar_prefetch=0,
            grid=(n_r, n_so, n_si),
            in_specs=[
                pl.BlockSpec((tr, ts), lambda r, so, si: (r, so * n_si + si)),
                pl.BlockSpec((tr, ts), lambda r, so, si: (r, so * n_si + si)),
            ],
            out_specs=pl.BlockSpec((1, 1, 1, 1), lambda r, so, si: (r, so, 0, 0)),
            scratch_shapes=[pltpu.VMEM((tr, ts), jnp.float32)],
        ),
        compiler_params=pltpu.CompilerParams(
            # Row tiles and spatial-outer chunks are independent (megacore-parallel
            # on v7x); the spatial-inner axis carries the accumulator.
            dimension_semantics=("parallel", "parallel", "arbitrary"),
            vmem_limit_bytes=vmem_limit,
            # Let XLA fuse the wrapper-side NHWC->NCHW transpose / reshapes into
            # the kernel operands instead of materializing them in HBM.
            allow_input_fusion=[True, True],
        ),
    )(pred2, lab2)

    # Python-float divisor: exact element count (a float32 count loses precision
    # past ~16M elements).
    return jnp.sum(partials) / float(R * S)


def bce_loss_2d(predict, target):
    """
    predict: (n, c, h, w) logits (NCHW)
    target : (n, h, w, c) labels in [0, 1] (NHWC)
    Mirrors BCELoss2d.forward / AchieveBCE_7 (BCEWithLogitsLoss, mean reduction).
    """
    n, c, h, w = predict.shape
    nt, ht, wt, ct = target.shape
    if n != nt or c != ct:
        raise ValueError(f"batch/channel mismatch: pred {predict.shape} vs label {target.shape}")
    if (h, w) != (ht, wt):
        # TODO(synk): bilinear align_corners=True resize of the logits (F.interpolate)
        # is not implemented in-kernel; spatial dims must already match.
        raise NotImplementedError("interpolation path not implemented")

    pred2 = predict.reshape(n * c, h * w)
    # label.permute(0, 3, 1, 2) -> NCHW, then flatten to a lane-dense (n*c, h*w) slab.
    # allow_input_fusion on the pallas_call lets XLA fuse this producer into the
    # kernel operand instead of spending a separate HBM round trip on it.
    # TODO(synk): for lane-friendly C (C % 128 == 0), read target in its native
    # (n, h*w, c) layout via its own BlockSpec and relayout the (ts, C) tile
    # in-kernel (XLU slot is idle here), removing the transpose entirely.
    lab2 = jnp.transpose(target, (0, 3, 1, 2)).reshape(n * c, h * w)
    return bce_with_logits_mean_2d(pred2, lab2)


def _reference(predict, target):
    # Pure-JAX reference for sanity checking.
    x = predict.astype(jnp.float32)
    y = jnp.transpose(target, (0, 3, 1, 2)).astype(jnp.float32)
    loss = jnp.maximum(x, 0.0) - x * y + jnp.log1p(jnp.exp(-jnp.abs(x)))
    return jnp.mean(loss)


if __name__ == "__main__":
    key = jax.random.PRNGKey(0)
    k1, k2 = jax.random.split(key)
    n, c, h, w = 2, 4, 16, 16
    predict = jax.random.normal(k1, (n, c, h, w), dtype=jnp.float32)   # NCHW logits
    target = jax.random.uniform(k2, (n, h, w, c), dtype=jnp.float32)   # NHWC labels

    out = jax.block_until_ready(bce_loss_2d(predict, target))
    ref = jax.block_until_ready(_reference(predict, target))
    assert jnp.allclose(out, ref, rtol=1e-5, atol=1e-6), (out, ref)
    print("KERNEL_OK")
</pallas_src>

<mosaic_0001>
module attributes {stable_mosaic.version = 11 : i64} {
  func.func @_bce_partial_kernel(%arg0: i32, %arg1: i32, %arg2: i32, %arg3: memref<8x256xf32, #tpu.memory_space<vmem>>, %arg4: memref<8x256xf32, #tpu.memory_space<vmem>>, %arg5: memref<1x1x1x1xf32, #tpu.memory_space<vmem>>, %arg6: memref<8x256xf32, #tpu.memory_space<vmem>>) attributes {dimension_semantics = [#tpu.dimension_semantics<parallel>, #tpu.dimension_semantics<parallel>, #tpu.dimension_semantics<arbitrary>], iteration_bounds = array<i64: 1, 1, 1>, scalar_prefetch = 0 : i64, scratch_operands = 1 : i64, tpu.core_type = #tpu.core_type<tc>, window_params = [{transform_indices = @transform_0, window_bounds = array<i64: 8, 256>}, {transform_indices = @transform_1, window_bounds = array<i64: 8, 256>}, {transform_indices = @transform_2, window_bounds = array<i64: 1, 1, 1, 1>}]} {
    %c0 = arith.constant 0 : index
    %c0_0 = arith.constant 0 : index
    %0 = vector.load %arg3[%c0, %c0_0] : memref<8x256xf32, #tpu.memory_space<vmem>>, vector<8x256xf32>
    %c0_1 = arith.constant 0 : index
    %c0_2 = arith.constant 0 : index
    %1 = vector.load %arg4[%c0_1, %c0_2] : memref<8x256xf32, #tpu.memory_space<vmem>>, vector<8x256xf32>
    %cst = arith.constant 0.000000e+00 : f32
    %2 = vector.broadcast %cst : f32 to vector<8x256xf32>
    %3 = arith.maximumf %0, %2 : vector<8x256xf32>
    %4 = arith.mulf %0, %1 : vector<8x256xf32>
    %5 = arith.subf %3, %4 : vector<8x256xf32>
    %6 = math.absf %0 : vector<8x256xf32>
    %cst_3 = arith.constant 0.000000e+00 : f32
    %7 = vector.broadcast %cst_3 : f32 to vector<8x256xf32>
    %8 = arith.subf %7, %6 : vector<8x256xf32>
    %9 = math.exp %8 : vector<8x256xf32>
    %10 = math.log1p %9 : vector<8x256xf32>
    %11 = arith.addf %5, %10 : vector<8x256xf32>
    %c0_i32 = arith.constant 0 : i32
    %12 = arith.cmpi eq, %arg2, %c0_i32 : i32
    %13 = arith.extui %12 : i1 to i32
    %c0_i32_4 = arith.constant 0 : i32
    %14 = arith.cmpi ne, %13, %c0_i32_4 : i32
    scf.if %14 {
      %c0_9 = arith.constant 0 : index
      %c0_10 = arith.constant 0 : index
      %21 = vector.load %arg6[%c0_9, %c0_10] : memref<8x256xf32, #tpu.memory_space<vmem>>, vector<8x256xf32>
      tpu.vector_store %arg6[%c0_9, %c0_10], %11 {strides = array<i32>} : memref<8x256xf32, #tpu.memory_space<vmem>>, vector<8x256xf32>,
    } else {
    }
    %c0_i32_5 = arith.constant 0 : i32
    %15 = arith.cmpi sgt, %arg2, %c0_i32_5 : i32
    %16 = arith.extui %15 : i1 to i32
    %c0_i32_6 = arith.constant 0 : i32
    %17 = arith.cmpi ne, %16, %c0_i32_6 : i32
    scf.if %17 {
      %c0_9 = arith.constant 0 : index
      %c0_10 = arith.constant 0 : index
      %21 = vector.load %arg6[%c0_9, %c0_10] : memref<8x256xf32, #tpu.memory_space<vmem>>, vector<8x256xf32>
      %22 = arith.addf %21, %11 : vector<8x256xf32>
      %c0_11 = arith.constant 0 : index
      %c0_12 = arith.constant 0 : index
      %23 = vector.load %arg6[%c0_11, %c0_12] : memref<8x256xf32, #tpu.memory_space<vmem>>, vector<8x256xf32>
      tpu.vector_store %arg6[%c0_11, %c0_12], %22 {strides = array<i32>} : memref<8x256xf32, #tpu.memory_space<vmem>>, vector<8x256xf32>,
    } else {
    }
    %c0_i32_7 = arith.constant 0 : i32
    %18 = arith.cmpi eq, %arg2, %c0_i32_7 : i32
    %19 = arith.extui %18 : i1 to i32
    %c0_i32_8 = arith.constant 0 : i32
    %20 = arith.cmpi ne, %19, %c0_i32_8 : i32
    scf.if %20 {
      %c0_9 = arith.constant 0 : index
      %c0_10 = arith.constant 0 : index
      %21 = vector.load %arg6[%c0_9, %c0_10] : memref<8x256xf32, #tpu.memory_space<vmem>>, vector<8x256xf32>
      %22 = vector.shape_cast %21 : vector<8x256xf32> to vector<1x8x256xf32>
      %cst_11 = arith.constant dense<0.000000e+00> : vector<1xf32>
      %23 = vector.multi_reduction <add>, %22, %cst_11 [1, 2] : vector<1x8x256xf32> to vector<1xf32>
      %24 = vector.shape_cast %23 : vector<1xf32> to vector<1x1x1xf32>
      %25 = vector.extract %24[0, 0, 0] : f32 from vector<1x1x1xf32>
      %26 = vector.broadcast %25 : f32 to vector<1x1x1x1xf32>
      %c0_12 = arith.constant 0 : index
      %c0_13 = arith.constant 0 : index
      %c0_14 = arith.constant 0 : index
      %c0_15 = arith.constant 0 : index
      %27 = vector.load %arg5[%c0_12, %c0_13, %c0_14, %c0_15] : memref<1x1x1x1xf32, #tpu.memory_space<vmem>>, vector<1x1x1x1xf32>
      tpu.vector_store %arg5[%c0_12, %c0_13, %c0_14, %c0_15], %26 {strides = array<i32>} : memref<1x1x1x1xf32, #tpu.memory_space<vmem>>, vector<1x1x1x1xf32>,
    } else {
    }
    return
  }
  func.func @transform_0(%arg0: i32, %arg1: i32, %arg2: i32) -> (i32, i32) {
    %c1_i32 = arith.constant 1 : i32
    %0 = arith.muli %arg1, %c1_i32 : i32
    %1 = arith.addi %0, %arg2 : i32
    %c0_i32 = arith.constant 0 : i32
    return %arg0, %1 : i32, i32
  }
  func.func @transform_1(%arg0: i32, %arg1: i32, %arg2: i32) -> (i32, i32) {
    %c1_i32 = arith.constant 1 : i32
    %0 = arith.muli %arg1, %c1_i32 : i32
    %1 = arith.addi %0, %arg2 : i32
    %c0_i32 = arith.constant 0 : i32
    return %arg0, %1 : i32, i32
  }
  func.func @transform_2(%arg0: i32, %arg1: i32, %arg2: i32) -> (i32, i32, i32, i32) {
    %c0_i32 = arith.constant 0 : i32
    %c0_i32_0 = arith.constant 0 : i32
    %c0_i32_1 = arith.constant 0 : i32
    return %arg0, %arg1, %c0_i32, %c0_i32_0 : i32, i32, i32, i32
  }
}

</mosaic_0001>

<bundles_post_ra>
// kernel: tpu_custom_call.1
= control target key start
LH: loop header
LB: loop body
LE: loop exit
PB: predicated region body
PF: predicated region fallthrough
CT: control target
= control target key end

     0   :  { %7 = vsyncpa [#allocation4], 0  ;;  %s275_s0 = inlined_call_operand.hbm [shape: f32[8,256], index: 0, kind: input, shape index: {}]   ;;  %s276_s1 = inlined_call_operand.hbm [shape: f32[8,256], index: 1, kind: input, shape index: {}]   ;;  %s277_s2 = inlined_call_operand.hbm [shape: f32[1,1,1,1], index: 2, kind: output, shape index: {}]  }
   0x1   :  { %8 = vsyncpa [#allocation7], 0 }
   0x2   :  { %9 = vsyncpa [#allocation5], 0  ;;  %s221_s9 = smov [#allocation3]   ;;  %s222_s11 = smov [#allocation6]  }
   0x3   :  { %s20_s10 = sshll.u32 %s221_s9, 4  ;;  %s34_s12 = sshll.u32 %s222_s11, 4  ;;  %s21_s10 = int_to_ptr.vmem [resolvable:$true] %s20_s10  ;;  %s35_s12 = int_to_ptr.vmem [resolvable:$true] %s34_s12 }
   0x4   :  { %s149_s15 = scalar_lea.hbm %s275_s0, 256 }
   0x5   :  { %p150_p0 = scmp.ne.s32.totalorder %s275_s0, %s149_s15  ;;  %p153_p1 = scmp.lt.u32.totalorder %s149_s15, %s275_s0 }
   0x7   :  { %p155_p2 = pnand %p153_p1, %p150_p0 }
   0x9   :  { %158 = shalt.err (!%p155_p2)
}
   0xa   :  { %s159_s20 = scalar_lea.vmem %s21_s10, 256  ;;  %p164_p4 = scmp.lt.s32.totalorder %s21_s10, %s21_s10 }
   0xb   :  { %p160_p3 = scmp.ne.s32.totalorder %s21_s10, %s159_s20  ;;  %p165_p5 = scmp.lt.s32.totalorder %s159_s20, %s159_s20 }
   0xd   :  { %p166_p6 = por %p165_p5, %p164_p4 }
   0xf   :  { %p167_p7 = pnand %p166_p6, %p160_p3 }
  0x11   :  { %170 = shalt.err (!%p167_p7)
}
  0x12   :  { %23 = dma.hbm_to_vmem [thread:$0]  %s275_s0, 256, %s21_s10, [#allocation4]  }
  0x13   :  { %s171_s25 = scalar_lea.hbm %s276_s1, 256 }
  0x14   :  { %p172_p8 = scmp.ne.s32.totalorder %s276_s1, %s171_s25  ;;  %p175_p9 = scmp.lt.u32.totalorder %s171_s25, %s276_s1 }
  0x16   :  { %p177_p10 = pnand %p175_p9, %p172_p8 }
  0x18   :  { %180 = shalt.err (!%p177_p10)
}
  0x19   :  { %s181_s30 = scalar_lea.vmem %s35_s12, 256  ;;  %p186_p12 = scmp.lt.s32.totalorder %s35_s12, %s35_s12 }
  0x1a   :  { %p182_p11 = scmp.ne.s32.totalorder %s35_s12, %s181_s30  ;;  %p187_p13 = scmp.lt.s32.totalorder %s181_s30, %s181_s30 }
  0x1c   :  { %p188_p0 = por %p187_p13, %p186_p12 }
  0x1e   :  { %p189_p1 = pnand %p188_p0, %p182_p11 }
  0x20   :  { %192 = shalt.err (!%p189_p1)
}
  0x21   :  { %37 = dma.hbm_to_vmem [thread:$0]  %s276_s1, 256, %s35_s12, [#allocation7]  }
  0x22   :  { %215 = dma.done.wait [#allocation4], 256  }
  0x23   :  { %216 = vsyncadd [#allocation4], 4294967040 }
  0x24   :  { %217 = dma.done.wait [#allocation7], 256  }
  0x25   :  { %218 = vsyncadd [#allocation7], 4294967040  ;;  %v48_v0 = vld [vmem:[#allocation3] sm:$0xff]  ;;  %v49_v1 = vld [vmem:[#allocation3 + $0x8] sm:$0xff]  ;;  %s223_s1 = smov [#allocation8]   ;;  %vm118_vm2 = vcmask 0  }
  0x26   :  { %v58_v2 = vand.u32 2147483647, %v48_v0  ;;  %v59_v3 = vand.u32 2147483647, %v49_v1  ;;  %v50_v14 = vld [vmem:[#allocation6] sm:$0xff]  ;;  %v51_v15 = vld [vmem:[#allocation6 + $0x8] sm:$0xff] }
  0x27   :  { %v52_v17 = vmax.f32 %v48_v0, 0.0  ;;  %v54_v18 = vmul.f32 %v50_v14, %v48_v0  ;;  %v53_v21 = vmax.f32 %v49_v1, 0.0  ;;  %v55_v22 = vmul.f32 %v51_v15, %v49_v1  ;;  %s126_s4 = sshll.u32 %s223_s1, 4  ;;  %s127_s4 = int_to_ptr.vmem [resolvable:$true] %s126_s4 }
  0x28   :  { %v60_v4 = vsub.f32 0.0, %v58_v2  ;;  %v61_v5 = vsub.f32 0.0, %v59_v3  ;;  %s193_s6 = scalar_lea.vmem %s127_s4, 16  ;;  %s197_s7 = scalar_lea.vmem %s127_s4, 32 }
  0x29   :  { %v56_v26 = vsub.f32 %v52_v17, %v54_v18  ;;  %v57_v29 = vsub.f32 %v53_v21, %v55_v22  ;;  %p194_p2 = scmp.ne.s32.totalorder %s127_s4, %s193_s6  ;;  %p198_p3 = scmp.lt.s32.totalorder %s127_s4, %s127_s4 }
  0x2a   :  { %v62_v6 = vmul.f32 1.442695, %v60_v4  ;;  %v64_v7 = vmul.f32 1.442695, %v61_v5  ;;  %p199_p4 = scmp.lt.s32.totalorder %s197_s7, %s193_s6 }
  0x2c   :  { %141 = vpow2.f32 %v62_v6  ;;  %p200_p5 = por %p199_p4, %p198_p3 }
  0x2d   :  { %143 = vpow2.f32 %v64_v7 }
  0x2e   :  { %p201_p6 = pnand %p200_p5, %p194_p2 }
  0x36   :  { %v142_v8 = vpop.eup %141 }
  0x37   :  { %v144_v9 = vpop.eup %143  ;;  %v66_v10 = vadd.f32 1.0, %v142_v8  ;;  %v69_v12 = vmul.f32 -0.5, %v142_v8  ;;  %v72_v19 = vand.u32 2147483647, %v142_v8 }
  0x38   :  { %v75_v11 = vadd.f32 1.0, %v144_v9  ;;  %v78_v13 = vmul.f32 -0.5, %v144_v9  ;;  %v81_v23 = vand.u32 2147483647, %v144_v9 }
  0x39   :  { %145 = vlog2.f32 %v66_v10  ;;  %v70_v16 = vadd.f32 1.0, %v69_v12  ;;  %vm73_vm0 = vcmp.lt.f32.partialorder %v72_v19, 0.0004427343 }
  0x3a   :  { %147 = vlog2.f32 %v75_v11  ;;  %v79_v20 = vadd.f32 1.0, %v78_v13  ;;  %vm82_vm1 = vcmp.lt.f32.partialorder %v81_v23, 0.0004427343 }
  0x3b   :  { %v71_v24 = vmul.f32 %v142_v8, %v70_v16 }
  0x3c   :  { %v80_v27 = vmul.f32 %v144_v9, %v79_v20 }
  0x43   :  { %v146_v25 = vpop.eup %145 }
  0x44   :  { %v148_v28 = vpop.eup %147  ;;  %v68_v30 = vmul.f32 0.6931472, %v146_v25 }
  0x45   :  { %v77_v31 = vmul.f32 0.6931472, %v148_v28 }
  0x46   :  { %v74_v32 = vsel %vm73_vm0, %v71_v24, %v68_v30 }
  0x47   :  { %v83_v33 = vsel %vm82_vm1, %v80_v27, %v77_v31  ;;  %v84_v34 = vadd.f32 %v74_v32, %v56_v26 }
  0x48   :  { %v85_v35 = vadd.f32 %v83_v33, %v57_v29 }
  0x4a   :  { %v107_v36 = vadd.f32 %v85_v35, %v84_v34 }
  0x4c   :  { %108 = vadd.xlane.f32.xlu0 %v107_v36 }
  0xd9   :  { %v109_v37 = vpop.xlane.xlu0 %108 }
  0xda   :  { %v110_v38 = vrot.slane %v109_v37, 4 }
  0xdc   :  { %v111_v39 = vadd.f32 %v110_v38, %v109_v37 }
  0xde   :  { %v112_v40 = vrot.slane %v111_v39, 2 }
  0xe0   :  { %v113_v41 = vadd.f32 %v112_v40, %v111_v39 }
  0xe2   :  { %v114_v42 = vrot.slane %v113_v41, 1 }
  0xe4   :  { %v115_v43 = vadd.f32 %v114_v42, %v113_v41 }
  0xe6   :  { %136 = vpush %v115_v43 }
 0x117   :  { %s137_s5 = spop %136 }
 0x118   :  { %v117_v44 = vstv %s137_s5 }
 0x119   :  { %119 = vst.msk [vmem:[#allocation8] sm:$0x1] %vm118_vm2, %v117_v44 }
 0x11a   :  { %204 = shalt.err (!%p201_p6)
}
 0x11b   :  { %s205_s10 = scalar_lea.hbm %s277_s2, 16 }
 0x11c   :  { %p206_p7 = scmp.ne.s32.totalorder %s277_s2, %s205_s10  ;;  %p209_p8 = scmp.lt.u32.totalorder %s205_s10, %s277_s2 }
 0x11e   :  { %p211_p9 = pnand %p209_p8, %p206_p7 }
 0x120   :  { %214 = shalt.err (!%p211_p9)
}
 0x121   :  { %129 = dma.vmem_to_hbm [thread:$0]  %s127_s4, 16, %s277_s2, [#allocation5]  }
 0x122   :  { %219 = dma.done.wait [#allocation5], 16  }
 0x123   :  { %220 = vsyncadd [#allocation5], 4294967280 }
 0x124   :  { %133 = vsyncpa [#allocation4], 1 }
 0x125   :  { %134 = vsyncpa [#allocation7], 1 }
 0x126   :  { %135 = vsyncpa [#allocation5], 1 }

</bundles_post_ra>
